<compile_context>
chip_gen: v7x
topology: tpu7x:2x2x1
jax: 0.10.0
libtpu: 0.0.40
codegen_flags: <defaults>
</compile_context>

<pallas_src>
import math
import functools

import jax
import jax.numpy as jnp
from jax import lax
from jax.experimental import pallas as pl
from jax.experimental.pallas import tpu as pltpu


# ------------------------------ helpers ------------------------------------

def _pick_tile(dim, candidates=(512, 256, 128, 64, 32, 16, 8)):
    """Largest candidate that divides `dim` (multiple of 8), else the full dim."""
    for c in candidates:
        if c <= dim and dim % c == 0:
            return c
    return dim


# -------------------------- fused QKV projection ----------------------------

def _qkv_proj_kernel(xq_ref, xk_ref, xv_ref, w_ref, b_ref,
                     qo_ref, ko_ref, vo_ref, *, embed_dim):
    """One M-tile of q/k/v in-projections with the packed (3E, E) weight."""
    E = embed_dim

    def proj(x_ref, row0, brow, o_ref):
        # PyTorch linear: x @ W^T + b with W stored (out, in).  Contract the
        # last dims of both operands -> no transpose is ever materialized.
        w = w_ref[row0:row0 + E, :]                               # (E, E)
        acc = lax.dot_general(x_ref[...], w,
                              (((1,), (1,)), ((), ())),
                              preferred_element_type=jnp.float32)  # (tm, E)
        o_ref[...] = (acc + b_ref[brow:brow + 1, :]).astype(o_ref.dtype)

    proj(xq_ref, 0, 0, qo_ref)
    proj(xk_ref, E, 1, ko_ref)
    proj(xv_ref, 2 * E, 2, vo_ref)


def pallas_qkv_proj(xq, xk, xv, w_packed, b_packed):
    """xq/xk/xv: (M, E); w_packed: (3E, E) PyTorch layout; b_packed: (3, E)."""
    M, E = xq.shape
    tm = _pick_tile(M)
    x_spec = pl.BlockSpec((tm, E), lambda i: (i, 0))
    w_spec = pl.BlockSpec((3 * E, E), lambda i: (0, 0))   # resident across grid
    b_spec = pl.BlockSpec((3, E), lambda i: (0, 0))
    o_spec = pl.BlockSpec((tm, E), lambda i: (i, 0))

    flops = 3 * 2 * M * E * E
    bytes_accessed = 4 * (3 * M * E + 3 * E * E + 3 * E + 3 * M * E)

    kernel = functools.partial(_qkv_proj_kernel, embed_dim=E)
    return pl.pallas_call(
        kernel,
        out_shape=tuple(jax.ShapeDtypeStruct((M, E), xq.dtype) for _ in range(3)),
        grid=(pl.cdiv(M, tm),),
        in_specs=[x_spec, x_spec, x_spec, w_spec, b_spec],
        out_specs=(o_spec, o_spec, o_spec),
        compiler_params=pltpu.CompilerParams(dimension_semantics=("parallel",)),
        cost_estimate=pl.CostEstimate(flops=flops, transcendentals=0,
                                      bytes_accessed=bytes_accessed),
    )(xq, xk, xv, w_packed, b_packed)


# ------------------------------ out projection ------------------------------

def _linear_kernel(x_ref, w_ref, b_ref, o_ref):
    # y = x @ W^T + b, W in PyTorch (out, in) layout; contract last dims.
    acc = lax.dot_general(x_ref[...], w_ref[...],
                          (((1,), (1,)), ((), ())),
                          preferred_element_type=jnp.float32)
    o_ref[...] = (acc + b_ref[...]).astype(o_ref.dtype)


def pallas_linear(x, w, b):
    """x: (M, K); w: (N, K) PyTorch (out,in); b: (1, N) -> x @ w.T + b."""
    M, K = x.shape
    N = w.shape[0]
    tm = _pick_tile(M)

    flops = 2 * M * K * N
    bytes_accessed = 4 * (M * K + N * K + N + M * N)

    return pl.pallas_call(
        _linear_kernel,
        out_shape=jax.ShapeDtypeStruct((M, N), x.dtype),
        grid=(pl.cdiv(M, tm),),
        in_specs=[pl.BlockSpec((tm, K), lambda i: (i, 0)),
                  pl.BlockSpec((N, K), lambda i: (0, 0)),
                  pl.BlockSpec((1, N), lambda i: (0, 0))],
        out_specs=pl.BlockSpec((tm, N), lambda i: (i, 0)),
        compiler_params=pltpu.CompilerParams(dimension_semantics=("parallel",)),
        cost_estimate=pl.CostEstimate(flops=flops, transcendentals=0,
                                      bytes_accessed=bytes_accessed),
    )(x, w, b)


# ------------------------- flash attention kernel ---------------------------

def _mha_attn_kernel(q_ref, k_ref, v_ref, o_ref, m_ref, l_ref, acc_ref,
                     *, scale, num_heads, head_dim):
    """Online-softmax attention over one (batch, q-tile, kv-tile) grid step.

    Blocks are (1, tq, E) / (1, tk, E) with all H heads packed along the lane
    (E = H*D) axis, so the head split never goes through HBM and every store
    (running state and output) is a single lane-dense vst per buffer.
    Scratch: m, l per (row, head); acc per (row, E); all carried across the
    innermost ("arbitrary") kv grid axis.
    """
    H, D = num_heads, head_dim
    ki = pl.program_id(2)

    @pl.when(ki == 0)
    def _init():
        m_ref[...] = jnp.full(m_ref.shape, -jnp.inf, jnp.float32)
        l_ref[...] = jnp.zeros(l_ref.shape, jnp.float32)
        acc_ref[...] = jnp.zeros(acc_ref.shape, jnp.float32)

    # One lane-dense load per running-state buffer; per-head slices stay in
    # vregs (no masked sub-slab VMEM traffic inside the head loop).
    m_prev = m_ref[...]        # (tq, H)  f32
    l_prev = l_ref[...]        # (tq, H)  f32
    acc_prev = acc_ref[...]    # (tq, E)  f32

    q_all = q_ref[0]           # (tq, E)  input dtype
    k_all = k_ref[0]           # (tk, E)
    v_all = v_ref[0]           # (tk, E)

    m_parts, l_parts, acc_parts = [], [], []
    # Statically unrolled per-head loop (H is small & compile-time constant).
    for h in range(H):
        sl = slice(h * D, (h + 1) * D)
        qh = q_all[:, sl] * scale          # fold softmax scale into q (tq, D)
        kh = k_all[:, sl]                  # (tk, D)
        vh = v_all[:, sl]                  # (tk, D)

        # scores = (q*scale) @ k^T  (contract last dims -> no transpose)
        s = lax.dot_general(qh, kh, (((1,), (1,)), ((), ())),
                            preferred_element_type=jnp.float32)   # (tq, tk)

        m_p = m_prev[:, h:h + 1]                                  # (tq, 1)
        l_p = l_prev[:, h:h + 1]                                  # (tq, 1)
        m_n = jnp.maximum(m_p, jnp.max(s, axis=-1, keepdims=True))
        alpha = jnp.exp(m_p - m_n)         # accumulator rescale
        p = jnp.exp(s - m_n)               # (tq, tk)

        pv = jnp.dot(p.astype(vh.dtype), vh,
                     preferred_element_type=jnp.float32)          # (tq, D)

        m_parts.append(m_n)
        l_parts.append(alpha * l_p + jnp.sum(p, axis=-1, keepdims=True))
        acc_parts.append(alpha * acc_prev[:, sl] + pv)

    # One lane-dense store per buffer per kv step.
    m_ref[...] = jnp.concatenate(m_parts, axis=-1)
    l_ref[...] = jnp.concatenate(l_parts, axis=-1)
    acc_ref[...] = jnp.concatenate(acc_parts, axis=-1)

    @pl.when(ki == pl.num_programs(2) - 1)
    def _finalize():
        l_all = l_ref[...]                               # (tq, H)
        inv = pl.reciprocal(l_all, approx=True)          # EUP slot (nearly free)
        inv = inv * (2.0 - l_all * inv)                  # one Newton step -> ~f32
        acc = acc_ref[...]                               # (tq, E)
        parts = [acc[:, h * D:(h + 1) * D] * inv[:, h:h + 1] for h in range(H)]
        # Single lane-dense store of the whole (tq, E) output tile.
        o_ref[0] = jnp.concatenate(parts, axis=-1).astype(o_ref.dtype)


def pallas_attention(q, k, v, num_heads, scale, *, block_q=256, block_k=256):
    """q, k, v: (B, S, E) head-major packed (E = H*D) -> context (B, S, E)."""
    B, S, E = q.shape
    H = num_heads
    D = E // H
    tq = _pick_tile(S, (block_q, 512, 256, 128, 64, 32, 16, 8))
    tk = _pick_tile(S, (block_k, 512, 256, 128, 64, 32, 16, 8))
    nq, nk = S // tq, S // tk

    kernel = functools.partial(_mha_attn_kernel, scale=scale,
                               num_heads=H, head_dim=D)
    q_spec = pl.BlockSpec((1, tq, E), lambda b, qi, ki: (b, qi, 0))
    kv_spec = pl.BlockSpec((1, tk, E), lambda b, qi, ki: (b, ki, 0))
    o_spec = pl.BlockSpec((1, tq, E), lambda b, qi, ki: (b, qi, 0))

    flops = 4 * B * H * S * S * D          # QK^T + PV
    transcendentals = B * H * S * S        # exp
    bytes_accessed = 4 * 4 * B * S * E     # q, k, v in + ctx out (f32)

    return pl.pallas_call(
        kernel,
        out_shape=jax.ShapeDtypeStruct((B, S, E), q.dtype),
        grid=(B, nq, nk),
        in_specs=[q_spec, kv_spec, kv_spec],
        out_specs=o_spec,
        scratch_shapes=[
            pltpu.VMEM((tq, H), jnp.float32),   # running max  m
            pltpu.VMEM((tq, H), jnp.float32),   # running sum  l
            pltpu.VMEM((tq, E), jnp.float32),   # accumulator  acc
        ],
        compiler_params=pltpu.CompilerParams(
            dimension_semantics=("parallel", "parallel", "arbitrary")),
        cost_estimate=pl.CostEstimate(flops=flops,
                                      transcendentals=transcendentals,
                                      bytes_accessed=bytes_accessed),
    )(q, k, v)


# ----------------------------- FlashMHA wrapper -----------------------------

def init_flash_mha_params(key, embed_dim, num_heads, dtype=jnp.float32):
    assert embed_dim % num_heads == 0
    head_dim = embed_dim // num_heads
    assert head_dim % 8 == 0 and head_dim <= 128
    k1, k2 = jax.random.split(key)
    limit_in = math.sqrt(6.0 / (3 * embed_dim + embed_dim))      # xavier_uniform_
    in_proj_weight = jax.random.uniform(
        k1, (3 * embed_dim, embed_dim), dtype, -limit_in, limit_in)
    in_proj_bias = jnp.zeros((3 * embed_dim,), dtype)
    limit_out = math.sqrt(6.0 / (embed_dim + embed_dim))
    out_proj_weight = jax.random.uniform(
        k2, (embed_dim, embed_dim), dtype, -limit_out, limit_out)
    out_proj_bias = jnp.zeros((embed_dim,), dtype)
    return {
        "in_proj_weight": in_proj_weight,     # (3E, E) PyTorch (out, in)
        "in_proj_bias": in_proj_bias,         # (3E,)
        "out_proj_weight": out_proj_weight,   # (E, E)  PyTorch (out, in)
        "out_proj_bias": out_proj_bias,       # (E,)
    }


def flash_mha_forward(params, q, k, v, num_heads, block_q=256, block_k=256):
    """FlashMHA.forward (eval, no key_padding_mask). Returns (out, None)."""
    B, S, E = q.shape
    H = num_heads
    D = E // H
    assert H * D == E
    M = B * S

    # Fused packed in-projection (one pallas_call, weights kept in PyTorch layout).
    qp, kp, vp = pallas_qkv_proj(
        q.reshape(M, E), k.reshape(M, E), v.reshape(M, E),
        params["in_proj_weight"], params["in_proj_bias"].reshape(3, E))

    # Flash attention directly on the head-major packed (B, S, E) layout:
    # no (B,S,H,D) -> (B*H,S,D) HBM transposes needed.
    scale = 1.0 / math.sqrt(D)     # softmax_scale=None default -> 1/sqrt(head_dim)
    ctx = pallas_attention(qp.reshape(B, S, E), kp.reshape(B, S, E),
                           vp.reshape(B, S, E), H, scale,
                           block_q=block_q, block_k=block_k)      # (B, S, E)

    out = pallas_linear(ctx.reshape(M, E), params["out_proj_weight"],
                        params["out_proj_bias"].reshape(1, E)).reshape(B, S, E)

    attn_weights = None            # return_attn_weights=False path
    return out, attn_weights


# ----------------------------- pure-JAX reference ---------------------------

def flash_mha_reference(params, q, k, v, num_heads):
    B, S, E = q.shape
    H = num_heads
    D = E // H
    w_q, w_k, w_v = jnp.split(params["in_proj_weight"], 3, axis=0)
    b_q, b_k, b_v = jnp.split(params["in_proj_bias"], 3)
    qh = (q @ w_q.T + b_q).reshape(B, S, H, D)
    kh = (k @ w_k.T + b_k).reshape(B, S, H, D)
    vh = (v @ w_v.T + b_v).reshape(B, S, H, D)
    s = jnp.einsum("bqhd,bkhd->bhqk", qh, kh) / math.sqrt(D)
    p = jax.nn.softmax(s, axis=-1)
    ctx = jnp.einsum("bhqk,bkhd->bqhd", p, vh).reshape(B, S, E)
    return ctx @ params["out_proj_weight"].T + params["out_proj_bias"]


# ----------------------------------- main -----------------------------------

if __name__ == "__main__":
    # embed_dim=32, num_heads=4 -> head_dim=8 (divisible by 8, <=128)
    B, S, E, H = 2, 16, 32, 4

    key = jax.random.PRNGKey(0)
    kp, kq, kk, kv = jax.random.split(key, 4)
    params = init_flash_mha_params(kp, E, H)
    q = jax.random.normal(kq, (B, S, E), jnp.float32)
    k = jax.random.normal(kk, (B, S, E), jnp.float32)
    v = jax.random.normal(kv, (B, S, E), jnp.float32)

    # Small blocks so the multi-tile online-softmax (kv) path is exercised.
    fwd = jax.jit(functools.partial(flash_mha_forward, num_heads=H,
                                    block_q=8, block_k=8))
    out, attn_w = fwd(params, q, k, v)
    out = jax.block_until_ready(out)

    ref = flash_mha_reference(params, q, k, v, H)
    assert out.shape == (B, S, E)
    assert attn_w is None
    assert jnp.allclose(out, ref, atol=1e-3, rtol=1e-3), "mismatch vs reference"

    print("KERNEL_OK")
</pallas_src>

<mosaic_0001>
module attributes {stable_mosaic.version = 11 : i64} {
  func.func @_mha_attn_kernel(%arg0: i32, %arg1: i32, %arg2: i32, %arg3: memref<1x8x32xf32, #tpu.memory_space<vmem>>, %arg4: memref<1x8x32xf32, #tpu.memory_space<vmem>>, %arg5: memref<1x8x32xf32, #tpu.memory_space<vmem>>, %arg6: memref<1x8x32xf32, #tpu.memory_space<vmem>>, %arg7: memref<8x4xf32, #tpu.memory_space<vmem>>, %arg8: memref<8x4xf32, #tpu.memory_space<vmem>>, %arg9: memref<8x32xf32, #tpu.memory_space<vmem>>) attributes {dimension_semantics = [#tpu.dimension_semantics<parallel>, #tpu.dimension_semantics<parallel>, #tpu.dimension_semantics<arbitrary>], iteration_bounds = array<i64: 2, 2, 2>, scalar_prefetch = 0 : i64, scratch_operands = 3 : i64, tpu.core_type = #tpu.core_type<tc>, window_params = [{transform_indices = @transform_0, window_bounds = array<i64: 1, 8, 32>}, {transform_indices = @transform_1, window_bounds = array<i64: 1, 8, 32>}, {transform_indices = @transform_2, window_bounds = array<i64: 1, 8, 32>}, {transform_indices = @transform_3, window_bounds = array<i64: 1, 8, 32>}]} {
    %c0_i32 = arith.constant 0 : i32
    %0 = arith.cmpi eq, %arg2, %c0_i32 : i32
    %1 = arith.extui %0 : i1 to i32
    %c0_i32_0 = arith.constant 0 : i32
    %2 = arith.cmpi ne, %1, %c0_i32_0 : i32
    scf.if %2 {
      %cst_41 = arith.constant 0xFF800000 : f32
      %121 = vector.broadcast %cst_41 : f32 to vector<8x4xf32>
      %c0_42 = arith.constant 0 : index
      %c0_43 = arith.constant 0 : index
      %122 = vector.load %arg7[%c0_42, %c0_43] : memref<8x4xf32, #tpu.memory_space<vmem>>, vector<8x4xf32>
      tpu.vector_store %arg7[%c0_42, %c0_43], %121 {strides = array<i32>} : memref<8x4xf32, #tpu.memory_space<vmem>>, vector<8x4xf32>,
      %cst_44 = arith.constant 0.000000e+00 : f32
      %123 = vector.broadcast %cst_44 : f32 to vector<8x4xf32>
      %c0_45 = arith.constant 0 : index
      %c0_46 = arith.constant 0 : index
      %124 = vector.load %arg8[%c0_45, %c0_46] : memref<8x4xf32, #tpu.memory_space<vmem>>, vector<8x4xf32>
      tpu.vector_store %arg8[%c0_45, %c0_46], %123 {strides = array<i32>} : memref<8x4xf32, #tpu.memory_space<vmem>>, vector<8x4xf32>,
      %cst_47 = arith.constant 0.000000e+00 : f32
      %125 = vector.broadcast %cst_47 : f32 to vector<8x32xf32>
      %c0_48 = arith.constant 0 : index
      %c0_49 = arith.constant 0 : index
      %126 = vector.load %arg9[%c0_48, %c0_49] : memref<8x32xf32, #tpu.memory_space<vmem>>, vector<8x32xf32>
      tpu.vector_store %arg9[%c0_48, %c0_49], %125 {strides = array<i32>} : memref<8x32xf32, #tpu.memory_space<vmem>>, vector<8x32xf32>,
    } else {
    }
    %c0 = arith.constant 0 : index
    %c0_1 = arith.constant 0 : index
    %3 = vector.load %arg7[%c0, %c0_1] : memref<8x4xf32, #tpu.memory_space<vmem>>, vector<8x4xf32>
    %c0_2 = arith.constant 0 : index
    %c0_3 = arith.constant 0 : index
    %4 = vector.load %arg8[%c0_2, %c0_3] : memref<8x4xf32, #tpu.memory_space<vmem>>, vector<8x4xf32>
    %c0_4 = arith.constant 0 : index
    %c0_5 = arith.constant 0 : index
    %5 = vector.load %arg9[%c0_4, %c0_5] : memref<8x32xf32, #tpu.memory_space<vmem>>, vector<8x32xf32>
    %c0_6 = arith.constant 0 : index
    %c0_7 = arith.constant 0 : index
    %c0_8 = arith.constant 0 : index
    %6 = vector.load %arg3[%c0_6, %c0_7, %c0_8] : memref<1x8x32xf32, #tpu.memory_space<vmem>>, vector<1x8x32xf32>
    %7 = vector.shape_cast %6 : vector<1x8x32xf32> to vector<8x32xf32>
    %c0_9 = arith.constant 0 : index
    %c0_10 = arith.constant 0 : index
    %c0_11 = arith.constant 0 : index
    %8 = vector.load %arg4[%c0_9, %c0_10, %c0_11] : memref<1x8x32xf32, #tpu.memory_space<vmem>>, vector<1x8x32xf32>
    %9 = vector.shape_cast %8 : vector<1x8x32xf32> to vector<8x32xf32>
    %c0_12 = arith.constant 0 : index
    %c0_13 = arith.constant 0 : index
    %c0_14 = arith.constant 0 : index
    %10 = vector.load %arg5[%c0_12, %c0_13, %c0_14] : memref<1x8x32xf32, #tpu.memory_space<vmem>>, vector<1x8x32xf32>
    %11 = vector.shape_cast %10 : vector<1x8x32xf32> to vector<8x32xf32>
    %12 = vector.extract_strided_slice %7 {offsets = [0, 0], sizes = [8, 8], strides = [1, 1]} : vector<8x32xf32> to vector<8x8xf32>
    %cst = arith.constant 0.353553385 : f32
    %13 = vector.broadcast %cst : f32 to vector<8x8xf32>
    %14 = arith.mulf %12, %13 : vector<8x8xf32>
    %15 = vector.extract_strided_slice %9 {offsets = [0, 0], sizes = [8, 8], strides = [1, 1]} : vector<8x32xf32> to vector<8x8xf32>
    %16 = vector.extract_strided_slice %11 {offsets = [0, 0], sizes = [8, 8], strides = [1, 1]} : vector<8x32xf32> to vector<8x8xf32>
    %cst_15 = arith.constant dense<0.000000e+00> : vector<8x8xf32>
    %17 = tpu.matmul %14, %15, %cst_15 {dimension_numbers = #tpu.dot_dimension_numbers<[1], [1], [0], [0], [0, 0, 1, 0], [], []>} : vector<8x8xf32>, vector<8x8xf32>, vector<8x8xf32> -> vector<8x8xf32>
    %18 = vector.extract_strided_slice %3 {offsets = [0, 0], sizes = [8, 1], strides = [1, 1]} : vector<8x4xf32> to vector<8x1xf32>
    %19 = vector.extract_strided_slice %4 {offsets = [0, 0], sizes = [8, 1], strides = [1, 1]} : vector<8x4xf32> to vector<8x1xf32>
    %cst_16 = arith.constant dense<0xFF800000> : vector<8xf32>
    %20 = vector.multi_reduction <maximumf>, %17, %cst_16 [1] : vector<8x8xf32> to vector<8xf32>
    %21 = vector.shape_cast %20 : vector<8xf32> to vector<8x1xf32>
    %22 = arith.maximumf %18, %21 : vector<8x1xf32>
    %23 = arith.subf %18, %22 : vector<8x1xf32>
    %24 = math.exp %23 : vector<8x1xf32>
    %25 = vector.broadcast %22 : vector<8x1xf32> to vector<8x8xf32>
    %26 = arith.subf %17, %25 : vector<8x8xf32>
    %27 = math.exp %26 : vector<8x8xf32>
    %cst_17 = arith.constant dense<0.000000e+00> : vector<8x8xf32>
    %28 = tpu.matmul %27, %16, %cst_17 {dimension_numbers = #tpu.dot_dimension_numbers<[1], [0], [0], [1], [0, 0, 1, 1], [], []>} : vector<8x8xf32>, vector<8x8xf32>, vector<8x8xf32> -> vector<8x8xf32>
    %29 = arith.mulf %24, %19 : vector<8x1xf32>
    %cst_18 = arith.constant dense<0.000000e+00> : vector<8xf32>
    %30 = vector.multi_reduction <add>, %27, %cst_18 [1] : vector<8x8xf32> to vector<8xf32>
    %31 = vector.shape_cast %30 : vector<8xf32> to vector<8x1xf32>
    %32 = arith.addf %29, %31 : vector<8x1xf32>
    %33 = vector.extract_strided_slice %5 {offsets = [0, 0], sizes = [8, 8], strides = [1, 1]} : vector<8x32xf32> to vector<8x8xf32>
    %34 = vector.broadcast %24 : vector<8x1xf32> to vector<8x8xf32>
    %35 = arith.mulf %34, %33 : vector<8x8xf32>
    %36 = arith.addf %35, %28 : vector<8x8xf32>
    %37 = vector.extract_strided_slice %7 {offsets = [0, 8], sizes = [8, 8], strides = [1, 1]} : vector<8x32xf32> to vector<8x8xf32>
    %cst_19 = arith.constant 0.353553385 : f32
    %38 = vector.broadcast %cst_19 : f32 to vector<8x8xf32>
    %39 = arith.mulf %37, %38 : vector<8x8xf32>
    %40 = vector.extract_strided_slice %9 {offsets = [0, 8], sizes = [8, 8], strides = [1, 1]} : vector<8x32xf32> to vector<8x8xf32>
    %41 = vector.extract_strided_slice %11 {offsets = [0, 8], sizes = [8, 8], strides = [1, 1]} : vector<8x32xf32> to vector<8x8xf32>
    %cst_20 = arith.constant dense<0.000000e+00> : vector<8x8xf32>
    %42 = tpu.matmul %39, %40, %cst_20 {dimension_numbers = #tpu.dot_dimension_numbers<[1], [1], [0], [0], [0, 0, 1, 0], [], []>} : vector<8x8xf32>, vector<8x8xf32>, vector<8x8xf32> -> vector<8x8xf32>
    %43 = vector.extract_strided_slice %3 {offsets = [0, 1], sizes = [8, 1], strides = [1, 1]} : vector<8x4xf32> to vector<8x1xf32>
    %44 = vector.extract_strided_slice %4 {offsets = [0, 1], sizes = [8, 1], strides = [1, 1]} : vector<8x4xf32> to vector<8x1xf32>
    %cst_21 = arith.constant dense<0xFF800000> : vector<8xf32>
    %45 = vector.multi_reduction <maximumf>, %42, %cst_21 [1] : vector<8x8xf32> to vector<8xf32>
    %46 = vector.shape_cast %45 : vector<8xf32> to vector<8x1xf32>
    %47 = arith.maximumf %43, %46 : vector<8x1xf32>
    %48 = arith.subf %43, %47 : vector<8x1xf32>
    %49 = math.exp %48 : vector<8x1xf32>
    %50 = vector.broadcast %47 : vector<8x1xf32> to vector<8x8xf32>
    %51 = arith.subf %42, %50 : vector<8x8xf32>
    %52 = math.exp %51 : vector<8x8xf32>
    %cst_22 = arith.constant dense<0.000000e+00> : vector<8x8xf32>
    %53 = tpu.matmul %52, %41, %cst_22 {dimension_numbers = #tpu.dot_dimension_numbers<[1], [0], [0], [1], [0, 0, 1, 1], [], []>} : vector<8x8xf32>, vector<8x8xf32>, vector<8x8xf32> -> vector<8x8xf32>
    %54 = arith.mulf %49, %44 : vector<8x1xf32>
    %cst_23 = arith.constant dense<0.000000e+00> : vector<8xf32>
    %55 = vector.multi_reduction <add>, %52, %cst_23 [1] : vector<8x8xf32> to vector<8xf32>
    %56 = vector.shape_cast %55 : vector<8xf32> to vector<8x1xf32>
    %57 = arith.addf %54, %56 : vector<8x1xf32>
    %58 = vector.extract_strided_slice %5 {offsets = [0, 8], sizes = [8, 8], strides = [1, 1]} : vector<8x32xf32> to vector<8x8xf32>
    %59 = vector.broadcast %49 : vector<8x1xf32> to vector<8x8xf32>
    %60 = arith.mulf %59, %58 : vector<8x8xf32>
    %61 = arith.addf %60, %53 : vector<8x8xf32>
    %62 = vector.extract_strided_slice %7 {offsets = [0, 16], sizes = [8, 8], strides = [1, 1]} : vector<8x32xf32> to vector<8x8xf32>
    %cst_24 = arith.constant 0.353553385 : f32
    %63 = vector.broadcast %cst_24 : f32 to vector<8x8xf32>
    %64 = arith.mulf %62, %63 : vector<8x8xf32>
    %65 = vector.extract_strided_slice %9 {offsets = [0, 16], sizes = [8, 8], strides = [1, 1]} : vector<8x32xf32> to vector<8x8xf32>
    %66 = vector.extract_strided_slice %11 {offsets = [0, 16], sizes = [8, 8], strides = [1, 1]} : vector<8x32xf32> to vector<8x8xf32>
    %cst_25 = arith.constant dense<0.000000e+00> : vector<8x8xf32>
    %67 = tpu.matmul %64, %65, %cst_25 {dimension_numbers = #tpu.dot_dimension_numbers<[1], [1], [0], [0], [0, 0, 1, 0], [], []>} : vector<8x8xf32>, vector<8x8xf32>, vector<8x8xf32> -> vector<8x8xf32>
    %68 = vector.extract_strided_slice %3 {offsets = [0, 2], sizes = [8, 1], strides = [1, 1]} : vector<8x4xf32> to vector<8x1xf32>
    %69 = vector.extract_strided_slice %4 {offsets = [0, 2], sizes = [8, 1], strides = [1, 1]} : vector<8x4xf32> to vector<8x1xf32>
    %cst_26 = arith.constant dense<0xFF800000> : vector<8xf32>
    %70 = vector.multi_reduction <maximumf>, %67, %cst_26 [1] : vector<8x8xf32> to vector<8xf32>
    %71 = vector.shape_cast %70 : vector<8xf32> to vector<8x1xf32>
    %72 = arith.maximumf %68, %71 : vector<8x1xf32>
    %73 = arith.subf %68, %72 : vector<8x1xf32>
    %74 = math.exp %73 : vector<8x1xf32>
    %75 = vector.broadcast %72 : vector<8x1xf32> to vector<8x8xf32>
    %76 = arith.subf %67, %75 : vector<8x8xf32>
    %77 = math.exp %76 : vector<8x8xf32>
    %cst_27 = arith.constant dense<0.000000e+00> : vector<8x8xf32>
    %78 = tpu.matmul %77, %66, %cst_27 {dimension_numbers = #tpu.dot_dimension_numbers<[1], [0], [0], [1], [0, 0, 1, 1], [], []>} : vector<8x8xf32>, vector<8x8xf32>, vector<8x8xf32> -> vector<8x8xf32>
    %79 = arith.mulf %74, %69 : vector<8x1xf32>
    %cst_28 = arith.constant dense<0.000000e+00> : vector<8xf32>
    %80 = vector.multi_reduction <add>, %77, %cst_28 [1] : vector<8x8xf32> to vector<8xf32>
    %81 = vector.shape_cast %80 : vector<8xf32> to vector<8x1xf32>
    %82 = arith.addf %79, %81 : vector<8x1xf32>
    %83 = vector.extract_strided_slice %5 {offsets = [0, 16], sizes = [8, 8], strides = [1, 1]} : vector<8x32xf32> to vector<8x8xf32>
    %84 = vector.broadcast %74 : vector<8x1xf32> to vector<8x8xf32>
    %85 = arith.mulf %84, %83 : vector<8x8xf32>
    %86 = arith.addf %85, %78 : vector<8x8xf32>
    %87 = vector.extract_strided_slice %7 {offsets = [0, 24], sizes = [8, 8], strides = [1, 1]} : vector<8x32xf32> to vector<8x8xf32>
    %cst_29 = arith.constant 0.353553385 : f32
    %88 = vector.broadcast %cst_29 : f32 to vector<8x8xf32>
    %89 = arith.mulf %87, %88 : vector<8x8xf32>
    %90 = vector.extract_strided_slice %9 {offsets = [0, 24], sizes = [8, 8], strides = [1, 1]} : vector<8x32xf32> to vector<8x8xf32>
    %91 = vector.extract_strided_slice %11 {offsets = [0, 24], sizes = [8, 8], strides = [1, 1]} : vector<8x32xf32> to vector<8x8xf32>
    %cst_30 = arith.constant dense<0.000000e+00> : vector<8x8xf32>
    %92 = tpu.matmul %89, %90, %cst_30 {dimension_numbers = #tpu.dot_dimension_numbers<[1], [1], [0], [0], [0, 0, 1, 0], [], []>} : vector<8x8xf32>, vector<8x8xf32>, vector<8x8xf32> -> vector<8x8xf32>
    %93 = vector.extract_strided_slice %3 {offsets = [0, 3], sizes = [8, 1], strides = [1, 1]} : vector<8x4xf32> to vector<8x1xf32>
    %94 = vector.extract_strided_slice %4 {offsets = [0, 3], sizes = [8, 1], strides = [1, 1]} : vector<8x4xf32> to vector<8x1xf32>
    %cst_31 = arith.constant dense<0xFF800000> : vector<8xf32>
    %95 = vector.multi_reduction <maximumf>, %92, %cst_31 [1] : vector<8x8xf32> to vector<8xf32>
    %96 = vector.shape_cast %95 : vector<8xf32> to vector<8x1xf32>
    %97 = arith.maximumf %93, %96 : vector<8x1xf32>
    %98 = arith.subf %93, %97 : vector<8x1xf32>
    %99 = math.exp %98 : vector<8x1xf32>
    %100 = vector.broadcast %97 : vector<8x1xf32> to vector<8x8xf32>
    %101 = arith.subf %92, %100 : vector<8x8xf32>
    %102 = math.exp %101 : vector<8x8xf32>
    %cst_32 = arith.constant dense<0.000000e+00> : vector<8x8xf32>
    %103 = tpu.matmul %102, %91, %cst_32 {dimension_numbers = #tpu.dot_dimension_numbers<[1], [0], [0], [1], [0, 0, 1, 1], [], []>} : vector<8x8xf32>, vector<8x8xf32>, vector<8x8xf32> -> vector<8x8xf32>
    %104 = arith.mulf %99, %94 : vector<8x1xf32>
    %cst_33 = arith.constant dense<0.000000e+00> : vector<8xf32>
    %105 = vector.multi_reduction <add>, %102, %cst_33 [1] : vector<8x8xf32> to vector<8xf32>
    %106 = vector.shape_cast %105 : vector<8xf32> to vector<8x1xf32>
    %107 = arith.addf %104, %106 : vector<8x1xf32>
    %108 = vector.extract_strided_slice %5 {offsets = [0, 24], sizes = [8, 8], strides = [1, 1]} : vector<8x32xf32> to vector<8x8xf32>
    %109 = vector.broadcast %99 : vector<8x1xf32> to vector<8x8xf32>
    %110 = arith.mulf %109, %108 : vector<8x8xf32>
    %111 = arith.addf %110, %103 : vector<8x8xf32>
    %112 = tpu.concatenate %22, %47, %72, %97 in 1 : vector<8x1xf32>, vector<8x1xf32>, vector<8x1xf32>, vector<8x1xf32> -> vector<8x4xf32>
    %c0_34 = arith.constant 0 : index
    %c0_35 = arith.constant 0 : index
    %113 = vector.load %arg7[%c0_34, %c0_35] : memref<8x4xf32, #tpu.memory_space<vmem>>, vector<8x4xf32>
    tpu.vector_store %arg7[%c0_34, %c0_35], %112 {strides = array<i32>} : memref<8x4xf32, #tpu.memory_space<vmem>>, vector<8x4xf32>,
    %114 = tpu.concatenate %32, %57, %82, %107 in 1 : vector<8x1xf32>, vector<8x1xf32>, vector<8x1xf32>, vector<8x1xf32> -> vector<8x4xf32>
    %c0_36 = arith.constant 0 : index
    %c0_37 = arith.constant 0 : index
    %115 = vector.load %arg8[%c0_36, %c0_37] : memref<8x4xf32, #tpu.memory_space<vmem>>, vector<8x4xf32>
    tpu.vector_store %arg8[%c0_36, %c0_37], %114 {strides = array<i32>} : memref<8x4xf32, #tpu.memory_space<vmem>>, vector<8x4xf32>,
    %116 = tpu.concatenate %36, %61, %86, %111 in 1 : vector<8x8xf32>, vector<8x8xf32>, vector<8x8xf32>, vector<8x8xf32> -> vector<8x32xf32>
    %c0_38 = arith.constant 0 : index
    %c0_39 = arith.constant 0 : index
    %117 = vector.load %arg9[%c0_38, %c0_39] : memref<8x32xf32, #tpu.memory_space<vmem>>, vector<8x32xf32>
    tpu.vector_store %arg9[%c0_38, %c0_39], %116 {strides = array<i32>} : memref<8x32xf32, #tpu.memory_space<vmem>>, vector<8x32xf32>,
    %c1_i32 = arith.constant 1 : i32
    %118 = arith.cmpi eq, %arg2, %c1_i32 : i32
    %119 = arith.extui %118 : i1 to i32
    %c0_i32_40 = arith.constant 0 : i32
    %120 = arith.cmpi ne, %119, %c0_i32_40 : i32
    scf.if %120 {
      %c0_41 = arith.constant 0 : index
      %c0_42 = arith.constant 0 : index
      %121 = vector.load %arg8[%c0_41, %c0_42] : memref<8x4xf32, #tpu.memory_space<vmem>>, vector<8x4xf32>
      %122 = tpu.reciprocal %121 {approx = true} : vector<8x4xf32> -> vector<8x4xf32>
      %123 = arith.mulf %121, %122 : vector<8x4xf32>
      %cst_43 = arith.constant 2.000000e+00 : f32
      %124 = vector.broadcast %cst_43 : f32 to vector<8x4xf32>
      %125 = arith.subf %124, %123 : vector<8x4xf32>
      %126 = arith.mulf %122, %125 : vector<8x4xf32>
      %c0_44 = arith.constant 0 : index
      %c0_45 = arith.constant 0 : index
      %127 = vector.load %arg9[%c0_44, %c0_45] : memref<8x32xf32, #tpu.memory_space<vmem>>, vector<8x32xf32>
      %128 = vector.extract_strided_slice %127 {offsets = [0, 0], sizes = [8, 8], strides = [1, 1]} : vector<8x32xf32> to vector<8x8xf32>
      %129 = vector.extract_strided_slice %126 {offsets = [0, 0], sizes = [8, 1], strides = [1, 1]} : vector<8x4xf32> to vector<8x1xf32>
      %130 = vector.broadcast %129 : vector<8x1xf32> to vector<8x8xf32>
      %131 = arith.mulf %128, %130 : vector<8x8xf32>
      %132 = vector.extract_strided_slice %127 {offsets = [0, 8], sizes = [8, 8], strides = [1, 1]} : vector<8x32xf32> to vector<8x8xf32>
      %133 = vector.extract_strided_slice %126 {offsets = [0, 1], sizes = [8, 1], strides = [1, 1]} : vector<8x4xf32> to vector<8x1xf32>
      %134 = vector.broadcast %133 : vector<8x1xf32> to vector<8x8xf32>
      %135 = arith.mulf %132, %134 : vector<8x8xf32>
      %136 = vector.extract_strided_slice %127 {offsets = [0, 16], sizes = [8, 8], strides = [1, 1]} : vector<8x32xf32> to vector<8x8xf32>
      %137 = vector.extract_strided_slice %126 {offsets = [0, 2], sizes = [8, 1], strides = [1, 1]} : vector<8x4xf32> to vector<8x1xf32>
      %138 = vector.broadcast %137 : vector<8x1xf32> to vector<8x8xf32>
      %139 = arith.mulf %136, %138 : vector<8x8xf32>
      %140 = vector.extract_strided_slice %127 {offsets = [0, 24], sizes = [8, 8], strides = [1, 1]} : vector<8x32xf32> to vector<8x8xf32>
      %141 = vector.extract_strided_slice %126 {offsets = [0, 3], sizes = [8, 1], strides = [1, 1]} : vector<8x4xf32> to vector<8x1xf32>
      %142 = vector.broadcast %141 : vector<8x1xf32> to vector<8x8xf32>
      %143 = arith.mulf %140, %142 : vector<8x8xf32>
      %144 = tpu.concatenate %131, %135, %139, %143 in 1 : vector<8x8xf32>, vector<8x8xf32>, vector<8x8xf32>, vector<8x8xf32> -> vector<8x32xf32>
      %c0_46 = arith.constant 0 : index
      %c0_47 = arith.constant 0 : index
      %c0_48 = arith.constant 0 : index
      %145 = vector.load %arg6[%c0_46, %c0_47, %c0_48] : memref<1x8x32xf32, #tpu.memory_space<vmem>>, vector<1x8x32xf32>
      %146 = vector.shape_cast %145 : vector<1x8x32xf32> to vector<8x32xf32>
      %147 = vector.shape_cast %144 : vector<8x32xf32> to vector<1x8x32xf32>
      tpu.vector_store %arg6[%c0_46, %c0_47, %c0_48], %147 {strides = array<i32>} : memref<1x8x32xf32, #tpu.memory_space<vmem>>, vector<1x8x32xf32>,
    } else {
    }
    return
  }
  func.func @transform_0(%arg0: i32, %arg1: i32, %arg2: i32) -> (i32, i32, i32) {
    %c0_i32 = arith.constant 0 : i32
    %c0_i32_0 = arith.constant 0 : i32
    return %arg0, %arg1, %c0_i32 : i32, i32, i32
  }
  func.func @transform_1(%arg0: i32, %arg1: i32, %arg2: i32) -> (i32, i32, i32) {
    %c0_i32 = arith.constant 0 : i32
    %c0_i32_0 = arith.constant 0 : i32
    return %arg0, %arg2, %c0_i32 : i32, i32, i32
  }
  func.func @transform_2(%arg0: i32, %arg1: i32, %arg2: i32) -> (i32, i32, i32) {
    %c0_i32 = arith.constant 0 : i32
    %c0_i32_0 = arith.constant 0 : i32
    return %arg0, %arg2, %c0_i32 : i32, i32, i32
  }
  func.func @transform_3(%arg0: i32, %arg1: i32, %arg2: i32) -> (i32, i32, i32) {
    %c0_i32 = arith.constant 0 : i32
    %c0_i32_0 = arith.constant 0 : i32
    return %arg0, %arg1, %c0_i32 : i32, i32, i32
  }
}

module attributes {stable_mosaic.version = 11 : i64} {
  func.func @_qkv_proj_kernel(%arg0: i32, %arg1: memref<32x32xf32, #tpu.memory_space<vmem>>, %arg2: memref<32x32xf32, #tpu.memory_space<vmem>>, %arg3: memref<32x32xf32, #tpu.memory_space<vmem>>, %arg4: memref<96x32xf32, #tpu.memory_space<vmem>>, %arg5: memref<3x32xf32, #tpu.memory_space<vmem>>, %arg6: memref<32x32xf32, #tpu.memory_space<vmem>>, %arg7: memref<32x32xf32, #tpu.memory_space<vmem>>, %arg8: memref<32x32xf32, #tpu.memory_space<vmem>>) attributes {dimension_semantics = [#tpu.dimension_semantics<parallel>], iteration_bounds = array<i64: 1>, scalar_prefetch = 0 : i64, scratch_operands = 0 : i64, tpu.core_type = #tpu.core_type<tc>, window_params = [{transform_indices = @transform_0, window_bounds = array<i64: 32, 32>}, {transform_indices = @transform_1, window_bounds = array<i64: 32, 32>}, {transform_indices = @transform_2, window_bounds = array<i64: 32, 32>}, {pipeline_mode = #tpu.pipeline_mode<synchronous>, transform_indices = @transform_3, window_bounds = array<i64: 96, 32>}, {pipeline_mode = #tpu.pipeline_mode<synchronous>, transform_indices = @transform_4, window_bounds = array<i64: 3, 32>}, {transform_indices = @transform_5, window_bounds = array<i64: 32, 32>}, {transform_indices = @transform_6, window_bounds = array<i64: 32, 32>}, {transform_indices = @transform_7, window_bounds = array<i64: 32, 32>}]} {
    %c0 = arith.constant 0 : index
    %c0_0 = arith.constant 0 : index
    %0 = vector.load %arg4[%c0, %c0_0] : memref<96x32xf32, #tpu.memory_space<vmem>>, vector<32x32xf32>
    %c0_1 = arith.constant 0 : index
    %c0_2 = arith.constant 0 : index
    %1 = vector.load %arg1[%c0_1, %c0_2] : memref<32x32xf32, #tpu.memory_space<vmem>>, vector<32x32xf32>
    %cst = arith.constant dense<0.000000e+00> : vector<32x32xf32>
    %2 = tpu.matmul %1, %0, %cst {dimension_numbers = #tpu.dot_dimension_numbers<[1], [1], [0], [0], [0, 0, 1, 0], [], []>} : vector<32x32xf32>, vector<32x32xf32>, vector<32x32xf32> -> vector<32x32xf32>
    %c0_3 = arith.constant 0 : index
    %c0_4 = arith.constant 0 : index
    %3 = vector.load %arg5[%c0_3, %c0_4] : memref<3x32xf32, #tpu.memory_space<vmem>>, vector<1x32xf32>
    %4 = vector.broadcast %3 : vector<1x32xf32> to vector<32x32xf32>
    %5 = arith.addf %2, %4 : vector<32x32xf32>
    %c0_5 = arith.constant 0 : index
    %c0_6 = arith.constant 0 : index
    %6 = vector.load %arg6[%c0_5, %c0_6] : memref<32x32xf32, #tpu.memory_space<vmem>>, vector<32x32xf32>
    tpu.vector_store %arg6[%c0_5, %c0_6], %5 {strides = array<i32>} : memref<32x32xf32, #tpu.memory_space<vmem>>, vector<32x32xf32>,
    %c32 = arith.constant 32 : index
    %c0_7 = arith.constant 0 : index
    %7 = vector.load %arg4[%c32, %c0_7] : memref<96x32xf32, #tpu.memory_space<vmem>>, vector<32x32xf32>
    %c0_8 = arith.constant 0 : index
    %c0_9 = arith.constant 0 : index
    %8 = vector.load %arg2[%c0_8, %c0_9] : memref<32x32xf32, #tpu.memory_space<vmem>>, vector<32x32xf32>
    %cst_10 = arith.constant dense<0.000000e+00> : vector<32x32xf32>
    %9 = tpu.matmul %8, %7, %cst_10 {dimension_numbers = #tpu.dot_dimension_numbers<[1], [1], [0], [0], [0, 0, 1, 0], [], []>} : vector<32x32xf32>, vector<32x32xf32>, vector<32x32xf32> -> vector<32x32xf32>
    %c1 = arith.constant 1 : index
    %c0_11 = arith.constant 0 : index
    %10 = vector.load %arg5[%c1, %c0_11] : memref<3x32xf32, #tpu.memory_space<vmem>>, vector<1x32xf32>
    %11 = vector.broadcast %10 : vector<1x32xf32> to vector<32x32xf32>
    %12 = arith.addf %9, %11 : vector<32x32xf32>
    %c0_12 = arith.constant 0 : index
    %c0_13 = arith.constant 0 : index
    %13 = vector.load %arg7[%c0_12, %c0_13] : memref<32x32xf32, #tpu.memory_space<vmem>>, vector<32x32xf32>
    tpu.vector_store %arg7[%c0_12, %c0_13], %12 {strides = array<i32>} : memref<32x32xf32, #tpu.memory_space<vmem>>, vector<32x32xf32>,
    %c64 = arith.constant 64 : index
    %c0_14 = arith.constant 0 : index
    %14 = vector.load %arg4[%c64, %c0_14] : memref<96x32xf32, #tpu.memory_space<vmem>>, vector<32x32xf32>
    %c0_15 = arith.constant 0 : index
    %c0_16 = arith.constant 0 : index
    %15 = vector.load %arg3[%c0_15, %c0_16] : memref<32x32xf32, #tpu.memory_space<vmem>>, vector<32x32xf32>
    %cst_17 = arith.constant dense<0.000000e+00> : vector<32x32xf32>
    %16 = tpu.matmul %15, %14, %cst_17 {dimension_numbers = #tpu.dot_dimension_numbers<[1], [1], [0], [0], [0, 0, 1, 0], [], []>} : vector<32x32xf32>, vector<32x32xf32>, vector<32x32xf32> -> vector<32x32xf32>
    %c2 = arith.constant 2 : index
    %c0_18 = arith.constant 0 : index
    %17 = vector.load %arg5[%c2, %c0_18] : memref<3x32xf32, #tpu.memory_space<vmem>>, vector<1x32xf32>
    %18 = vector.broadcast %17 : vector<1x32xf32> to vector<32x32xf32>
    %19 = arith.addf %16, %18 : vector<32x32xf32>
    %c0_19 = arith.constant 0 : index
    %c0_20 = arith.constant 0 : index
    %20 = vector.load %arg8[%c0_19, %c0_20] : memref<32x32xf32, #tpu.memory_space<vmem>>, vector<32x32xf32>
    tpu.vector_store %arg8[%c0_19, %c0_20], %19 {strides = array<i32>} : memref<32x32xf32, #tpu.memory_space<vmem>>, vector<32x32xf32>,
    return
  }
  func.func @transform_0(%arg0: i32) -> (i32, i32) {
    %c0_i32 = arith.constant 0 : i32
    %c0_i32_0 = arith.constant 0 : i32
    return %arg0, %c0_i32 : i32, i32
  }
  func.func @transform_1(%arg0: i32) -> (i32, i32) {
    %c0_i32 = arith.constant 0 : i32
    %c0_i32_0 = arith.constant 0 : i32
    return %arg0, %c0_i32 : i32, i32
  }
  func.func @transform_2(%arg0: i32) -> (i32, i32) {
    %c0_i32 = arith.constant 0 : i32
    %c0_i32_0 = arith.constant 0 : i32
    return %arg0, %c0_i32 : i32, i32
  }
  func.func @transform_3(%arg0: i32) -> (i32, i32) {
    %c0_i32 = arith.constant 0 : i32
    %c0_i32_0 = arith.constant 0 : i32
    %c0_i32_1 = arith.constant 0 : i32
    return %c0_i32, %c0_i32_0 : i32, i32
  }
  func.func @transform_4(%arg0: i32) -> (i32, i32) {
    %c0_i32 = arith.constant 0 : i32
    %c0_i32_0 = arith.constant 0 : i32
    %c0_i32_1 = arith.constant 0 : i32
    return %c0_i32, %c0_i32_0 : i32, i32
  }
  func.func @transform_5(%arg0: i32) -> (i32, i32) {
    %c0_i32 = arith.constant 0 : i32
    %c0_i32_0 = arith.constant 0 : i32
    return %arg0, %c0_i32 : i32, i32
  }
  func.func @transform_6(%arg0: i32) -> (i32, i32) {
    %c0_i32 = arith.constant 0 : i32
    %c0_i32_0 = arith.constant 0 : i32
    return %arg0, %c0_i32 : i32, i32
  }
  func.func @transform_7(%arg0: i32) -> (i32, i32) {
    %c0_i32 = arith.constant 0 : i32
    %c0_i32_0 = arith.constant 0 : i32
    return %arg0, %c0_i32 : i32, i32
  }
}

module attributes {stable_mosaic.version = 11 : i64} {
  func.func @_linear_kernel(%arg0: i32, %arg1: memref<32x32xf32, #tpu.memory_space<vmem>>, %arg2: memref<32x32xf32, #tpu.memory_space<vmem>>, %arg3: memref<1x32xf32, #tpu.memory_space<vmem>>, %arg4: memref<32x32xf32, #tpu.memory_space<vmem>>) attributes {dimension_semantics = [#tpu.dimension_semantics<parallel>], iteration_bounds = array<i64: 1>, scalar_prefetch = 0 : i64, scratch_operands = 0 : i64, tpu.core_type = #tpu.core_type<tc>, window_params = [{transform_indices = @transform_0, window_bounds = array<i64: 32, 32>}, {pipeline_mode = #tpu.pipeline_mode<synchronous>, transform_indices = @transform_1, window_bounds = array<i64: 32, 32>}, {pipeline_mode = #tpu.pipeline_mode<synchronous>, transform_indices = @transform_2, window_bounds = array<i64: 1, 32>}, {transform_indices = @transform_3, window_bounds = array<i64: 32, 32>}]} {
    %c0 = arith.constant 0 : index
    %c0_0 = arith.constant 0 : index
    %0 = vector.load %arg1[%c0, %c0_0] : memref<32x32xf32, #tpu.memory_space<vmem>>, vector<32x32xf32>
    %c0_1 = arith.constant 0 : index
    %c0_2 = arith.constant 0 : index
    %1 = vector.load %arg2[%c0_1, %c0_2] : memref<32x32xf32, #tpu.memory_space<vmem>>, vector<32x32xf32>
    %cst = arith.constant dense<0.000000e+00> : vector<32x32xf32>
    %2 = tpu.matmul %0, %1, %cst {dimension_numbers = #tpu.dot_dimension_numbers<[1], [1], [0], [0], [0, 0, 1, 0], [], []>} : vector<32x32xf32>, vector<32x32xf32>, vector<32x32xf32> -> vector<32x32xf32>
    %c0_3 = arith.constant 0 : index
    %c0_4 = arith.constant 0 : index
    %3 = vector.load %arg3[%c0_3, %c0_4] : memref<1x32xf32, #tpu.memory_space<vmem>>, vector<1x32xf32>
    %4 = vector.broadcast %3 : vector<1x32xf32> to vector<32x32xf32>
    %5 = arith.addf %2, %4 : vector<32x32xf32>
    %c0_5 = arith.constant 0 : index
    %c0_6 = arith.constant 0 : index
    %6 = vector.load %arg4[%c0_5, %c0_6] : memref<32x32xf32, #tpu.memory_space<vmem>>, vector<32x32xf32>
    tpu.vector_store %arg4[%c0_5, %c0_6], %5 {strides = array<i32>} : memref<32x32xf32, #tpu.memory_space<vmem>>, vector<32x32xf32>,
    return
  }
  func.func @transform_0(%arg0: i32) -> (i32, i32) {
    %c0_i32 = arith.constant 0 : i32
    %c0_i32_0 = arith.constant 0 : i32
    return %arg0, %c0_i32 : i32, i32
  }
  func.func @transform_1(%arg0: i32) -> (i32, i32) {
    %c0_i32 = arith.constant 0 : i32
    %c0_i32_0 = arith.constant 0 : i32
    %c0_i32_1 = arith.constant 0 : i32
    return %c0_i32, %c0_i32_0 : i32, i32
  }
  func.func @transform_2(%arg0: i32) -> (i32, i32) {
    %c0_i32 = arith.constant 0 : i32
    %c0_i32_0 = arith.constant 0 : i32
    %c0_i32_1 = arith.constant 0 : i32
    return %c0_i32, %c0_i32_0 : i32, i32
  }
  func.func @transform_3(%arg0: i32) -> (i32, i32) {
    %c0_i32 = arith.constant 0 : i32
    %c0_i32_0 = arith.constant 0 : i32
    return %arg0, %c0_i32 : i32, i32
  }
}

</mosaic_0001>

<bundles_post_ra>
// kernel: flash_mha_forward.3
= control target key start
LH: loop header
LB: loop body
LE: loop exit
PB: predicated region body
PF: predicated region fallthrough
CT: control target
= control target key end

     0   :  { %vm36_vm0 = vcmask 261120   ;;  %s766_s3 = inlined_call_operand.vmem [shape: f32[96,32], index: 3, kind: input, shape index: {}]   ;;  %s767_s0 = inlined_call_operand.vmem [shape: f32[32,32], index: 0, kind: input, shape index: {}]   ;;  %s768_s1 = inlined_call_operand.vmem [shape: f32[32,32], index: 1, kind: input, shape index: {}]   ;;  %s769_s2 = inlined_call_operand.vmem [shape: f32[32,32], index: 2, kind: input, shape index: {}]   ;;  %s770_s4 = inlined_call_operand.vmem [shape: f32[3,32], index: 4, kind: input, shape index: {}]   ;;  %s771_s5 = inlined_call_operand.vmem [shape: f32[32,32], index: 5, kind: output, shape index: {0}]   ;;  %s772_s6 = inlined_call_operand.vmem [shape: f32[32,32], index: 6, kind: output, shape index: {1}]   ;;  %s773_s7 = inlined_call_operand.vmem [shape: f32[32,32], index: 7, kind: output, shape index: {2}]  }
   0x1   :  { %v23_v0 = vld [vmem:[%s766_s3] sm:$0xff]  ;;  %v24_v1 = vld [vmem:[%s766_s3 + $0x8] sm:$0xff]  ;;  %vm595_vm1 = vmpackc.low %vm36_vm0, %vm36_vm0 }
   0x2   :  { %v507_v3 = vpack.c.bf16 %v24_v1, %v23_v0  ;;  %v150_v4 = vld [vmem:[%s766_s3 + $0x20] sm:$0xff]  ;;  %v151_v5 = vld [vmem:[%s766_s3 + $0x28] sm:$0xff]  ;;  %v25_v6 = vld [vmem:[%s766_s3 + $0x10] sm:$0xff] }
   0x3   :  { %v519_v7 = vpack.c.bf16 %v151_v5, %v150_v4  ;;  %v26_v8 = vld [vmem:[%s766_s3 + $0x18] sm:$0xff]  ;;  %v152_v9 = vld [vmem:[%s766_s3 + $0x30] sm:$0xff]  ;;  %v27_v13 = vld [vmem:[%s767_s0] sm:$0xff] }
   0x4   :  { %v153_v10 = vld [vmem:[%s766_s3 + $0x38] sm:$0xff]  ;;  %509 = vmatprep.subr.msk.bf16.mxu0 %vm595_vm1, %v507_v3  ;;  %v513_v11 = vpack.c.bf16 %v26_v8, %v25_v6  ;;  %v154_v14 = vld [vmem:[%s768_s1] sm:$0xff]  ;;  %473 = vmatprep.mubr.msk.f32.mxu0 %vm36_vm0, %v27_v13  ;;  %v277_v16 = vld [vmem:[%s766_s3 + $0x48] sm:$0xff] }
   0x5   :  { %v525_v12 = vpack.c.bf16 %v153_v10, %v152_v9  ;;  %521 = vmatprep.subr.msk.bf16.mxu1 %vm595_vm1, %v519_v7  ;;  %512 = vmatpush3.bf16.xpose.msk.msra.mxu0 %vm595_vm1, %v507_v3  ;;  %v276_v15 = vld [vmem:[%s766_s3 + $0x40] sm:$0xff]  ;;  %v278_v18 = vld [vmem:[%s766_s3 + $0x50] sm:$0xff]  ;;  %v279_v19 = vld [vmem:[%s766_s3 + $0x58] sm:$0xff] }
   0x6   :  { %524 = vmatpush3.bf16.xpose.msk.msra.mxu1 %vm595_vm1, %v519_v7  ;;  %515 = vmatprep.subr.msk.bf16.mxu0 %vm595_vm1, %v513_v11  ;;  %v531_v17 = vpack.c.bf16 %v277_v16, %v276_v15  ;;  %v28_v20 = vld [vmem:[%s767_s0 + $0x8] sm:$0xff]  ;;  %v537_v22 = vpack.c.bf16 %v279_v19, %v278_v18  ;;  %v29_v23 = vld [vmem:[%s767_s0 + $0x10] sm:$0xff]  ;;  %v30_v25 = vld [vmem:[%s767_s0 + $0x18] sm:$0xff] }
   0x7   :  { %527 = vmatprep.subr.msk.bf16.mxu1 %vm595_vm1, %v525_v12  ;;  %487 = vmatprep.mubr.msk.f32.mxu1 %vm36_vm0, %v154_v14  ;;  %v155_v21 = vld [vmem:[%s768_s1 + $0x8] sm:$0xff]  ;;  %v156_v24 = vld [vmem:[%s768_s1 + $0x10] sm:$0xff]  ;;  %v157_v26 = vld [vmem:[%s768_s1 + $0x18] sm:$0xff] }
   0x8   :  { %v280_v27 = vld [vmem:[%s769_s2] sm:$0xff]  ;;  %v282_v28 = vld [vmem:[%s769_s2 + $0x10] sm:$0xff]  ;;  %v281_v29 = vld [vmem:[%s769_s2 + $0x8] sm:$0xff] }
   0x9   :  { %v283_v30 = vld [vmem:[%s769_s2 + $0x18] sm:$0xff]  ;;  %v414_v31 = vld [vmem:[%s770_s4] ss:$0 sm:$0xff]  ;;  %v423_v32 = vld [vmem:[%s770_s4 + $0x1] ss:$0 sm:$0xff] }
   0xa   :  { %v432_v49 = vld [vmem:[%s770_s4 + $0x2] ss:$0 sm:$0xff] }
   0xd   :  { %518 = vmatpush3.bf16.xpose.msk.msra.mxu0 %vm595_vm1, %v513_v11 }
   0xe   :  { %530 = vmatpush3.bf16.xpose.msk.msra.mxu1 %vm595_vm1, %v525_v12  ;;  %533 = vmatprep.subr.msk.bf16.mxu0 %vm595_vm1, %v531_v17 }
   0xf   :  { %543 = vmatprep.subr.msk.bf16.mxu1 %vm595_vm1, %v531_v17 }
  0x14   :  { %474 = vmatmul.mubr.msk.f32.vlgmr.msra.gmra.mrb[0].mxu0 %vm36_vm0, %v28_v20 }
  0x15   :  { %488 = vmatmul.mubr.msk.f32.vlgmr.msra.gmra.mrb[0].mxu1 %vm36_vm0, %v155_v21  ;;  %536 = vmatpush3.bf16.xpose.msk.msra.mxu0 %vm595_vm1, %v531_v17 }
  0x16   :  { %545 = vmatpush3.bf16.xpose.msk.msra.mxu1 %vm595_vm1, %v531_v17  ;;  %539 = vmatprep.subr.msk.bf16.mxu0 %vm595_vm1, %v537_v22 }
  0x17   :  { %544 = vmatprep.subr.msk.bf16.mxu1 %vm595_vm1, %v537_v22  ;;  %476 = vmatprep.mubr.msk.f32.mxu0 %vm36_vm0, %v29_v23 }
  0x18   :  { %490 = vmatprep.mubr.msk.f32.mxu1 %vm36_vm0, %v156_v24  ;;  %477 = vmatmul.mubr.msk.f32.gmra.mrb[2].mxu0 %vm36_vm0, %v30_v25 }
  0x19   :  { %491 = vmatmul.mubr.msk.f32.gmra.mrb[2].mxu1 %vm36_vm0, %v157_v26  ;;  %501 = vmatprep.mubr.msk.f32.mxu0 %vm36_vm0, %v280_v27 }
  0x1a   :  { %504 = vmatprep.mubr.msk.f32.mxu1 %vm36_vm0, %v282_v28 }
  0x1d   :  { %542 = vmatpush3.bf16.xpose.msk.msra.mxu0 %vm595_vm1, %v537_v22 }
  0x1e   :  { %546 = vmatpush3.bf16.xpose.msk.msra.mxu1 %vm595_vm1, %v537_v22 }
  0x24   :  { %502 = vmatmul.mubr.msk.f32.vlgmr.msra.gmra.mrb[4].mxu0 %vm36_vm0, %v281_v29 }
  0x25   :  { %505 = vmatmul.mubr.msk.f32.vlgmr.msra.gmra.mrb[4].mxu1 %vm36_vm0, %v283_v30 }
  0xe7   :  { %v475_v33 = vpop.f32.mrb[0].mxu0 }
  0xe8   :  { %v133_v34 = vadd.f32 %v475_v33, %v414_v31  ;;  %v489_v35 = vpop.f32.mrb[0].mxu1  ;;  %v127_v36 = vpop.f32.mrb[1].mxu0 }
  0xe9   :  { %v259_v37 = vadd.f32 %v489_v35, %v423_v32  ;;  %v128_v38 = vadd.f32 %v414_v31, %v127_v36  ;;  %v253_v39 = vpop.f32.mrb[1].mxu1 }
  0xea   :  { %147 = vst.msk [vmem:[%s771_s5 + $0x8] sm:$0xff] %vm36_vm0, %v133_v34  ;;  %v254_v40 = vadd.f32 %v423_v32, %v253_v39 }
  0xeb   :  { %273 = vst.msk [vmem:[%s772_s6 + $0x8] sm:$0xff] %vm36_vm0, %v259_v37  ;;  %146 = vst.msk [vmem:[%s771_s5] sm:$0xff] %vm36_vm0, %v128_v38  ;;  %v478_v41 = vpop.f32.mrb[2].mxu0 }
  0xec   :  { %272 = vst.msk [vmem:[%s772_s6] sm:$0xff] %vm36_vm0, %v254_v40  ;;  %v143_v42 = vadd.f32 %v478_v41, %v414_v31  ;;  %v492_v43 = vpop.f32.mrb[2].mxu1  ;;  %v137_v44 = vpop.f32.mrb[3].mxu0 }
  0xed   :  { %v269_v45 = vadd.f32 %v492_v43, %v423_v32  ;;  %v138_v46 = vadd.f32 %v414_v31, %v137_v44  ;;  %v263_v47 = vpop.f32.mrb[3].mxu1 }
  0xee   :  { %149 = vst.msk [vmem:[%s771_s5 + $0x18] sm:$0xff] %vm36_vm0, %v143_v42  ;;  %v264_v48 = vadd.f32 %v423_v32, %v263_v47 }
  0xef   :  { %275 = vst.msk [vmem:[%s772_s6 + $0x18] sm:$0xff] %vm36_vm0, %v269_v45  ;;  %148 = vst.msk [vmem:[%s771_s5 + $0x10] sm:$0xff] %vm36_vm0, %v138_v46 }
  0xf0   :  { %274 = vst.msk [vmem:[%s772_s6 + $0x10] sm:$0xff] %vm36_vm0, %v264_v48 }
  0xf7   :  { %v503_v50 = vpop.f32.mrb[4].mxu0 }
  0xf8   :  { %v385_v51 = vadd.f32 %v503_v50, %v432_v49  ;;  %v506_v52 = vpop.f32.mrb[4].mxu1  ;;  %v379_v53 = vpop.f32.mrb[5].mxu0 }
  0xf9   :  { %v395_v54 = vadd.f32 %v506_v52, %v432_v49  ;;  %v380_v55 = vadd.f32 %v432_v49, %v379_v53  ;;  %v389_v56 = vpop.f32.mrb[5].mxu1 }
  0xfa   :  { %399 = vst.msk [vmem:[%s773_s7 + $0x8] sm:$0xff] %vm36_vm0, %v385_v51  ;;  %v390_v57 = vadd.f32 %v432_v49, %v389_v56 }
  0xfb   :  { %401 = vst.msk [vmem:[%s773_s7 + $0x18] sm:$0xff] %vm36_vm0, %v395_v54  ;;  %398 = vst.msk [vmem:[%s773_s7] sm:$0xff] %vm36_vm0, %v380_v55 }
  0xfc   :  { %400 = vst.msk [vmem:[%s773_s7 + $0x10] sm:$0xff] %vm36_vm0, %v390_v57 }

// kernel: flash_mha_forward.4
= control target key start
LH: loop header
LB: loop body
LE: loop exit
PB: predicated region body
PF: predicated region fallthrough
CT: control target
= control target key end

     0   :  { %s1487_s12 = smov 0   ;;  %s1489_s13 = smov 0   ;;  %s1694_s0 = inlined_call_operand.vmem [shape: f32[2,16,32], index: 0, kind: input, shape index: {}]   ;;  %s1695_s1 = inlined_call_operand.vmem [shape: f32[2,16,32], index: 1, kind: input, shape index: {}]   ;;  %s1696_s2 = inlined_call_operand.vmem [shape: f32[2,16,32], index: 2, kind: input, shape index: {}]   ;;  %s1697_s3 = inlined_call_operand.vmem [shape: f32[2,16,32], index: 3, kind: output, shape index: {}]  }
   0x1   :  { %s1491_s14 = smov 0   ;;  %s1493_s15 = smov 0  }
   0x2   :  { %s1495_s16 = smov 0   ;;  %s1497_s17 = smov 0  }
   0x3   :  { %s1499_s18 = smov 0  }
   0x4 LB: > { %s25_s19 = sadd.s32 1, %s1435_s15  ;;  %s28_s20 = sadd.s32 1, %s1439_s16  ;;  %s1447_s18 = sphi %s1499_s18, %s13_s18   ;;  %s1443_s17 = sphi %s1497_s17, %s1703_s17   ;;  %s1439_s16 = sphi %s1495_s16, %s1702_s16   ;;  %s1435_s15 = sphi %s1493_s15, %s1701_s15   ;;  %s1431_s14 = sphi %s1491_s14, %s1700_s14   ;;  %s1427_s13 = sphi %s1489_s13, %s1699_s13   ;;  %s1423_s12 = sphi %s1487_s12, %s1698_s12  }
   0x5   : > { %p26_p0 = scmp.ge.s32.totalorder %s25_s19, 2  ;;  %p1206_p1 = scmp.ge.s32.totalorder %s1447_s18, 1 }
   0x6   : > { %p193_p2 = scmp.lt.s32.totalorder %s1447_s18, 9  ;;  %s32_s21 = sadd.s32 1, %s1443_s17 }
   0x7   : > { %s1705_s19 = smov (%p26_p0, %s25_s19), 0  ;;  %s1707_s20 = smov (!%p26_p0, %s28_s20), %s1439_s16 }
   0x8   : > { %p194_p3 = pnand %p1206_p1, %p193_p2  ;;  %p30_p4 = scmp.ge.s32.totalorder %s1707_s20, 2 }
   0x9   : > { %p239_p6 = scmp.lt.s32.totalorder (!%p194_p3), %s1431_s14, 1  ;;  %p241_p7 = scmp.lt.s32.totalorder (!%p194_p3), %s1427_s13, 1 }
   0xa   : > { %s1709_s20 = smov (%p30_p4, %s1707_s20), 0  ;;  %s1711_s21 = smov (!%p30_p4, %s32_s21), %s1443_s17 }
   0xb   : > { %p34_p5 = scmp.ge.s32.totalorder %s1711_s21, 2  ;;  %197 = sbr.rel (%p194_p3) target bundleno = 1398 (0x576), region = 32 }
   0xc   : > { %p249_p8 = scmp.lt.s32.totalorder (!%p194_p3), %s1423_s12, 1  ;;  %p1215_p9 = scmp.ne.s32.totalorder (!%p194_p3), %s1423_s12, 0 }
   0xd   : > { %s1713_s21 = smov (%p34_p5, %s1711_s21), 0 }
  0x12   : > { %s1715_s14 = smov (!%p239_p6, %s1431_s14), 1  ;;  %s1717_s13 = smov (!%p241_p7, %s1427_s13), 1 }
  0x13   : > { %s1207_s22 = sshll.u32 %s1715_s14, 1  ;;  %vm275_vm0 = vcmask (!%p1215_p9), 31744   ;;  %vm278_vm1 = vcmask (!%p1215_p9), 261120   ;;  %v1449_v0 = vmov (!%p1215_p9), -inf   ;;  %v1450_v1 = vmov (!%p1215_p9), 0.0  }
  0x14   : > { %s244_s23 = sadd.s32 %s1207_s22, %s1717_s13  ;;  %276 = vst.msk [vmem:[#allocation2] sm:$0xff] (!%p1215_p9), %vm275_vm0, %v1449_v0  ;;  %277 = vst.msk [vmem:[#allocation3] sm:$0xff] (!%p1215_p9), %vm275_vm0, %v1450_v1 }
  0x15   : > { %s1208_s24 = sshll.u32 %s244_s23, 3  ;;  %274 = sbr.rel (%p1215_p9) target bundleno = 28 (0x1c), region = 36  ;;  %279 = vst.msk [vmem:[#allocation4] sm:$0xff] (!%p1215_p9), %vm278_vm1, %v1450_v1 }
  0x16   : > { %s246_s27 = scalar_lea.vmem %s1694_s0, %s1208_s24  ;;  %s1538_s30 = scalar_lea.vmem %s1697_s3, %s1208_s24 }
  0x17   : > { %s250_s4 = scalar_select %p249_p8, %s1423_s12, 1 }
  0x19   : > { %s252_s5 = sadd.s32 %s1207_s22, %s250_s4 }
  0x1a   : > { %s1210_s6 = sshll.u32 %s252_s5, 3 }
  0x1b   : > { %s254_s9 = scalar_lea.vmem %s1695_s1, %s1210_s6  ;;  %s1547_s13 = scalar_lea.vmem %s1696_s2, %s1210_s6 }
  0x1c PF: > { %v284_v2 = vld [vmem:[%s254_s9] sm:$0xff]  ;;  %vm287_vm2 = vcmask 64512   ;;  %v1451_v4 = vmov 0.0   ;;  %vm1452_vm3 = vmmov 0   ;;  %v1453_v9 = vmov 0   ;;  %s1454_s14 = smov 120  }
  0x1d   : > { %v283_v3 = vld [vmem:[%s246_s27] sm:$0xff]  ;;  %1247 = vmatprep.subr.mxu0 %v1451_v4  ;;  %1249 = vmatprep.mubr.msk.f32.mxu0 %vm1452_vm3, %v1451_v4  ;;  %s1455_s22 = smov 112   ;;  %s1456_s23 = smov 104   ;;  %v1457_v35 = vmov 1   ;;  %v1458_v36 = vmov 2   ;;  %vm1020_vm4 = vcmask 7168  }
  0x1e   : > { %v286_v5 = vmul.f32 0.35355338, %v283_v3  ;;  %1248 = vmatpush3.xpose.msk.msra.mxu0 %vm287_vm2, %v284_v2  ;;  %1252 = vmatprep.subr.mxu1 %v1451_v4  ;;  %v1569_v10 = vld [vmem:[#allocation2] sm:$0xff]  ;;  %vm1022_vm5 = vcmask 15360   ;;  %v1459_v44 = vmov 3   ;;  %vm1024_vm6 = vcmask 23552  }
  0x1f   : > { %1254 = vmatprep.mubr.msk.f32.mxu1 %vm1452_vm3, %v1451_v4  ;;  %1262 = vmatprep.subr.mxu0 %v1451_v4  ;;  %v1576_v13 = vld [vmem:[%s1547_s13] sm:$0xff]  ;;  %vm1026_vm7 = vcmask 31744   ;;  %v1633_v63 = vld [vmem:[#allocation4] sm:$0xff]  ;;  %s1460_s24 = smov 8   ;;  %s1461_s25 = smov 16   ;;  %vm1033_vm8 = vcmask 130048  }
  0x20   : > { %1361 = vset.pattern.permute.xlu0 %v1453_v9  ;;  %466 = vrot.lane.b32.xlu1 %v284_v2, %s1454_s14  ;;  %s1462_s26 = smov 24   ;;  %vm1035_vm9 = vcmask 195584   ;;  %vm1037_vm10 = vcmask 261120   ;;  %p1228_p10 = scmp.ne.s32.totalorder %s1423_s12, 1 }
  0x21   : > { %1250 = vmatmul.mubr.msk.f32.vlgmr.msra.gmra.mrb[0].mxu0 %vm287_vm2, %v286_v5  ;;  %1253 = vmatpush3.msra.mxu1 %v1576_v13 }
  0x22   : > { %1264 = vmatprep.mubr.msk.f32.mxu0 %vm1452_vm3, %v1451_v4  ;;  %1257 = vmatprep.subr.mxu1 %v1451_v4 }
  0x23   : > { %1362 = vset.pattern.permute.xlu1 %v1457_v35 }
  0x24   : > { %464 = vrot.lane.b32.xlu1 %v286_v5, %s1454_s14 }
  0x28   : > { %652 = vrot.lane.b32.xlu1 %v284_v2, %s1455_s22 }
  0x2c   : > { %650 = vrot.lane.b32.xlu1 %v286_v5, %s1455_s22 }
  0x30   : > { %837 = vrot.lane.b32.xlu1 %v284_v2, %s1456_s23 }
  0x34   : > { %835 = vrot.lane.b32.xlu1 %v286_v5, %s1456_s23 }
  0x92   : > { %v467_v14 = vpop.permute.xlu1 %466 }
  0x96   : > { %v465_v17 = vpop.permute.xlu1 %464 }
  0x9a   : > { %v653_v19 = vpop.permute.xlu1 %652 }
  0x9e   : > { %v651_v20 = vpop.permute.xlu1 %650 }
  0xa2   : > { %v838_v22 = vpop.permute.xlu1 %837 }
  0xa6   : > { %v836_v23 = vpop.permute.xlu1 %835 }
  0xf4   : > { %v360_v6 = vpop.f32.mrb[0].mxu0 }
  0xf5   : > { %v1251_v7 = vpop.f32.mrb[1].mxu0  ;;  %v364_v8 = vsel %vm287_vm2, %v360_v6, -inf }
  0xf6   : > { %365 = vmax.xlane.f32.xlu0 %v364_v8 }
 0x183   : > { %v366_v11 = vpop.xlane.xlu0 %365 }
 0x184   : > { %v1572_v12 = vmax.f32 %v1569_v10, %v366_v11 }
 0x186   : > { %373 = vperm.xlu0 %1361, %v1572_v12   ;;  %v368_v37 = vsub.f32 %v1569_v10, %v1572_v12 }
 0x188   : > { %v369_v38 = vmul.f32 1.442695, %v368_v37 }
 0x18a   : > { %1363 = vset.pattern.permute.xlu0 %v1458_v36 }
 0x205   : > { %v374_v15 = vpop.permute.xlu0 %373 }
 0x206   : > { %v376_v16 = vsub.f32 %v360_v6, %v374_v15 }
 0x208   : > { %v377_v18 = vmul.f32 1.442695, %v376_v16 }
 0x20a   : > { %1370 = vpow2.f32 %v377_v18 }
 0x20b   : > { %1372 = vpow2.f32 %v369_v38 }
 0x214   : > { %v1580_v21 = vpop.eup %1370 }
 0x215   : > { %1255 = vmatmul.mubr.msk.f32.vlgmr.msra.gmra.mrb[0].mxu1 %vm287_vm2, %v1580_v21  ;;  %v1615_v50 = vpop.eup %1372  ;;  %v453_v54 = vsel %vm287_vm2, %v1580_v21, 0.0  ;;  %v281_v21 = vld [vmem:[#allocation3] sm:$0xff] }
 0x216   : > { %1258 = vmatpush3.xpose.msk.msra.mxu1 %vm287_vm2, %v467_v14  ;;  %1259 = vmatprep.mubr.msk.f32.mxu1 %vm1452_vm3, %v1451_v4 }
 0x217   : > { %1267 = vmatprep.subr.mxu1 %v1451_v4 }
 0x219   : > { %1260 = vmatmul.mubr.msk.f32.vlgmr.msra.gmra.mrb[2].mxu1 %vm287_vm2, %v465_v17 }
 0x21a   : > { %1268 = vmatpush3.xpose.msk.msra.mxu1 %vm287_vm2, %v653_v19  ;;  %1269 = vmatprep.mubr.msk.f32.mxu1 %vm1452_vm3, %v1451_v4 }
 0x21b   : > { %1277 = vmatprep.subr.mxu1 %v1451_v4 }
 0x21d   : > { %1270 = vmatmul.mubr.msk.f32.vlgmr.msra.gmra.mrb[4].mxu1 %vm287_vm2, %v651_v20 }
 0x21e   : > { %1278 = vmatpush3.xpose.msk.msra.mxu1 %vm287_vm2, %v838_v22  ;;  %1279 = vmatprep.mubr.msk.f32.mxu1 %vm1452_vm3, %v1451_v4 }
 0x221   : > { %1280 = vmatmul.mubr.msk.f32.vlgmr.msra.gmra.mrb[6].mxu1 %vm287_vm2, %v836_v23 }
 0x2e8   : > { %v1598_v24 = vpop.f32.mrb[0].mxu1 }
 0x2e9   : > { %v1256_v25 = vpop.f32.mrb[1].mxu1 }
 0x2ea   : > { %v452_v25 = vmul.f32 %v1615_v50, %v281_v21 }
 0x2ec   : > { %v538_v26 = vpop.f32.mrb[2].mxu1 }
 0x2ed   : > { %v1261_v27 = vpop.f32.mrb[3].mxu1  ;;  %v542_v28 = vsel %vm287_vm2, %v538_v26, -inf }
 0x2ee   : > { %543 = vmax.xlane.f32.xlu1 %v542_v28 }
 0x2f0   : > { %v724_v29 = vpop.f32.mrb[4].mxu1 }
 0x2f1   : > { %v1271_v30 = vpop.f32.mrb[5].mxu1  ;;  %v728_v31 = vsel %vm287_vm2, %v724_v29, -inf }
 0x2f2   : > { %729 = vmax.xlane.f32.xlu0 %v728_v31 }
 0x2f4   : > { %v1602_v32 = vpop.f32.mrb[6].mxu1 }
 0x2f5   : > { %v1281_v33 = vpop.f32.mrb[7].mxu1  ;;  %v913_v34 = vsel %vm287_vm2, %v1602_v32, -inf }
 0x2f6   : > { %914 = vmax.xlane.f32.xlu1 %v913_v34 }
 0x37b   : > { %v544_v39 = vpop.xlane.xlu1 %543 }
 0x37c   : > { %v545_v40 = vmax.f32 %v1569_v10, %v544_v39 }
 0x37e   : > { %551 = vperm.xlu1 %1362, %v545_v40   ;;  %v1021_v46 = vsel %vm1020_vm4, %v1572_v12, %v545_v40  ;;  %v546_v53 = vsub.f32 %v1569_v10, %v545_v40 }
 0x37f   : > { %v730_v41 = vpop.xlane.xlu0 %729 }
 0x380   : > { %v731_v42 = vmax.f32 %v1569_v10, %v730_v41  ;;  %v547_v55 = vmul.f32 1.442695, %v546_v53 }
 0x382   : > { %v732_v43 = vsub.f32 %v1569_v10, %v731_v42  ;;  %737 = vperm.xlu0 %1363, %v731_v42   ;;  %1364 = vset.pattern.permute.xlu1 %v1459_v44  ;;  %v1023_v49 = vsel %vm1022_vm5, %v1021_v46, %v731_v42 }
 0x383   : > { %v915_v45 = vpop.xlane.xlu1 %914 }
 0x384   : > { %v733_v47 = vmul.f32 1.442695, %v732_v43  ;;  %v916_v48 = vmax.f32 %v1569_v10, %v915_v45 }
 0x386   : > { %1374 = vpow2.f32 %v733_v47  ;;  %v1025_v51 = vsel %vm1024_vm6, %v1023_v49, %v916_v48  ;;  %1365 = vset.pattern.permute.xlu0 %v1453_v9  ;;  %922 = vperm.xlu1 %1364, %v916_v48  }
 0x387   : > { %1027 = vst.msk [vmem:[#allocation2] sm:$0xff] %vm1026_vm7, %v1025_v51  ;;  %459 = vperm.xlu0 %1365, %v1615_v50   ;;  %1376 = vpow2.f32 %v547_v55 }
 0x38a   : > { %558 = vrot.lane.b32.xlu1 %v1576_v13, %s1454_s14 }
 0x38b   : > { %1367 = vset.pattern.permute.xlu0 %v1458_v36  ;;  %1366 = vset.pattern.permute.xlu1 %v1457_v35 }
 0x38e   : > { %743 = vrot.lane.b32.xlu1 %v1576_v13, %s1455_s22 }
 0x390   : > { %v1625_v52 = vpop.eup %1374 }
 0x391   : > { %826 = vperm.xlu0 %1367, %v1625_v52   ;;  %v1377_v56 = vpop.eup %1376 }
 0x392   : > { %928 = vrot.lane.b32.xlu1 %v1576_v13, %s1456_s23  ;;  %v917_v13 = vsub.f32 %v1569_v10, %v916_v48  ;;  %v634_v23 = vmul.f32 %v1377_v56, %v281_v21 }
 0x394   : > { %v918_v17 = vmul.f32 1.442695, %v917_v13 }
 0x395   : > { %1369 = vset.pattern.permute.xlu0 %v1459_v44 }
 0x3b6   : > { %454 = vadd.xlane.f32.xlu1 %v453_v54 }
 0x3c7   : > { %641 = vperm.xlu1 %1366, %v1377_v56   ;;  %v1463_v56 = vmov (!%p1228_p10), 0  }
 0x3c8   : > { %1386 = vset.pattern.permute.xlu0 (!%p1228_p10), %v1463_v56 }
 0x3cb   : > { %1368 = vset.pattern.permute.xlu1 %v1459_v44 }
 0x3fd   : > { %v552_v57 = vpop.permute.xlu1 %551 }
 0x3fe   : > { %v554_v58 = vsub.f32 %v538_v26, %v552_v57  ;;  %v1464_v57 = vmov (!%p1228_p10), 2  }
 0x400   : > { %v555_v59 = vmul.f32 1.442695, %v554_v58 }
 0x401   : > { %v738_v60 = vpop.permute.xlu0 %737 }
 0x402   : > { %1378 = vpow2.f32 %v555_v59  ;;  %v740_v61 = vsub.f32 %v724_v29, %v738_v60 }
 0x404   : > { %v741_v62 = vmul.f32 1.442695, %v740_v61 }
 0x405   : > { %v923_v0 = vpop.permute.xlu1 %922 }
 0x406   : > { %1380 = vpow2.f32 %v741_v62  ;;  %v925_v1 = vsub.f32 %v1602_v32, %v923_v0  ;;  %v460_v2 = vpop.permute.xlu0 %459  ;;  %v1465_v62 = vmov (!%p1228_p10), 1  }
 0x407   : > { %v462_v3 = vmul.f32 %v460_v2, %v1633_v63 }
 0x408   : > { %v926_v5 = vmul.f32 1.442695, %v925_v1 }
 0x409   : > { %v1638_v6 = vadd.f32 %v462_v3, %v1598_v24  ;;  %v559_v7 = vpop.permute.xlu1 %558 }
 0x40a   : > { %1382 = vpow2.f32 %v926_v5  ;;  %1263 = vmatpush3.msra.mxu0 %v559_v7 }
 0x40b   : > { %1272 = vmatprep.subr.mxu0 %v1451_v4  ;;  %1384 = vpow2.f32 %v918_v17 }
 0x40c   : > { %v1379_v8 = vpop.eup %1378 }
 0x40d   : > { %1265 = vmatmul.mubr.msk.f32.vlgmr.msra.gmra.mrb[2].mxu0 %vm287_vm2, %v1379_v8  ;;  %v744_v9 = vpop.permute.xlu1 %743  ;;  %v635_v11 = vsel %vm287_vm2, %v1379_v8, 0.0 }
 0x40e   : > { %1273 = vmatpush3.msra.mxu0 %v744_v9  ;;  %636 = vadd.xlane.f32.xlu0 %v635_v11 }
 0x40f   : > { %1274 = vmatprep.mubr.msk.f32.mxu0 %vm1452_vm3, %v1451_v4  ;;  %1282 = vmatprep.subr.mxu0 %v1451_v4 }
 0x410   : > { %v1381_v12 = vpop.eup %1380  ;;  %v827_v20 = vpop.permute.xlu0 %826 }
 0x411   : > { %1275 = vmatmul.mubr.msk.f32.vlgmr.msra.gmra.mrb[4].mxu0 %vm287_vm2, %v1381_v12  ;;  %v929_v14 = vpop.permute.xlu1 %928  ;;  %v820_v15 = vsel %vm287_vm2, %v1381_v12, 0.0  ;;  %v829_v45 = vmul.f32 %v827_v20, %v1633_v63 }
 0x412   : > { %821 = vadd.xlane.f32.xlu1 %v820_v15  ;;  %1283 = vmatpush3.msra.mxu0 %v929_v14 }
 0x413   : > { %1284 = vmatprep.mubr.msk.f32.mxu0 %vm1452_vm3, %v1451_v4  ;;  %v819_v4 = vmul.f32 %v1625_v52, %v281_v21 }
 0x414   : > { %v1383_v16 = vpop.eup %1382 }
 0x415   : > { %1285 = vmatmul.mubr.msk.f32.vlgmr.msra.gmra.mrb[6].mxu0 %vm287_vm2, %v1383_v16  ;;  %v1005_v18 = vsel %vm287_vm2, %v1383_v16, 0.0  ;;  %v1385_v19 = vpop.eup %1384 }
 0x416   : > { %1006 = vadd.xlane.f32.xlu0 %v1005_v18  ;;  %v1004_v32 = vmul.f32 %v1385_v19, %v281_v21 }
 0x423   : > { %1011 = vperm.xlu1 %1368, %v1385_v19  }
 0x427   : > { %1388 = vset.pattern.permute.xlu1 (!%p1228_p10), %v1464_v57 }
 0x443   : > { %v455_v10 = vpop.xlane.xlu1 %454 }
 0x444   : > { %v456_v27 = vadd.f32 %v455_v10, %v452_v25 }
 0x447   : > { %v642_v22 = vpop.permute.xlu1 %641 }
 0x448   : > { %v644_v44 = vmul.f32 %v642_v22, %v1633_v63 }
 0x49b   : > { %v637_v24 = vpop.xlane.xlu0 %636 }
 0x49c   : > { %v638_v26 = vadd.f32 %v637_v24, %v634_v23 }
 0x49e   : > { %v1028_v30 = vsel %vm1020_vm4, %v456_v27, %v638_v26 }
 0x49f   : > { %v822_v28 = vpop.xlane.xlu1 %821 }
 0x4a0   : > { %v823_v29 = vadd.f32 %v822_v28, %v819_v4 }
 0x4a2   : > { %v1029_v31 = vsel %vm1022_vm5, %v1028_v30, %v823_v29 }
 0x4a3   : > { %v1007_v33 = vpop.xlane.xlu0 %1006  ;;  %v1012_v42 = vpop.permute.xlu1 %1011 }
 0x4a4   : > { %v1008_v34 = vadd.f32 %v1007_v33, %v1004_v32  ;;  %v1014_v49 = vmul.f32 %v1012_v42, %v1633_v63  ;;  %v1466_v63 = vmov (!%p1228_p10), 3  }
 0x4a6   : > { %v1030_v35 = vsel %vm1024_vm6, %v1029_v31, %v1008_v34 }
 0x4a7   : > { %1031 = vst.msk [vmem:[#allocation3] sm:$0xff] %vm1026_vm7, %v1030_v35 }
 0x4ae   : > { %v1043_v55 = vld [vmem:[#allocation3] sm:$0xff] (!%p1228_p10) }
 0x4af   : > { %1391 = vrcp.f32 (!%p1228_p10), %v1043_v55 }
 0x4b9   : > { %v1392_v58 = vpop.eup (!%p1228_p10), %1391 }
 0x4ba   : > { %v1045_v59 = vmul.f32 (!%p1228_p10), %v1392_v58, %v1043_v55 }
 0x4bc   : > { %v1046_v60 = vsub.f32 (!%p1228_p10), 2.0, %v1045_v59 }
 0x4be   : > { %v1047_v61 = vmul.f32 (!%p1228_p10), %v1392_v58, %v1046_v60 }
 0x4c0   : > { %1051 = vperm.xlu0 (!%p1228_p10), %1386, %v1047_v61  }
 0x4c4   : > { %1387 = vset.pattern.permute.xlu0 (!%p1228_p10), %v1465_v62 }
 0x4c5   : > { %1056 = vperm.xlu0 (!%p1228_p10), %1387, %v1047_v61  }
 0x4c9   : > { %1390 = vset.pattern.permute.xlu0 (!%p1228_p10), %v1466_v63 }
 0x4e0   : > { %v630_v36 = vpop.f32.mrb[2].mxu0 }
 0x4e1   : > { %646 = vrot.lane.b32.xlu1 %v630_v36, %s1460_s24  ;;  %v1266_v37 = vpop.f32.mrb[3].mxu0 }
 0x4e4   : > { %v815_v38 = vpop.f32.mrb[4].mxu0 }
 0x4e5   : > { %831 = vrot.lane.b32.xlu1 %v815_v38, %s1461_s25  ;;  %v1276_v39 = vpop.f32.mrb[5].mxu0 }
 0x4e8   : > { %v1000_v40 = vpop.f32.mrb[6].mxu0 }
 0x4e9   : > { %1016 = vrot.lane.b32.xlu1 %v1000_v40, %s1462_s26  ;;  %v1286_v41 = vpop.f32.mrb[7].mxu0 }
 0x4ed   : > { %1061 = vperm.xlu1 (!%p1228_p10), %1388, %v1047_v61  }
 0x4f1   : > { %1389 = vset.pattern.permute.xlu1 (!%p1228_p10), %v1466_v63 }
 0x4f2   : > { %1066 = vperm.xlu1 (!%p1228_p10), %1389, %v1047_v61  }
 0x53f   : > { %v1052_v0 = vpop.permute.xlu0 (!%p1228_p10), %1051 }
 0x544   : > { %v1057_v3 = vpop.permute.xlu0 (!%p1228_p10), %1056 }
 0x553   : > { %v647_v43 = vpop.permute.xlu1 %646 }
 0x554   : > { %v649_v47 = vadd.f32 %v647_v43, %v644_v44 }
 0x556   : > { %v1032_v51 = vsel %vm287_vm2, %v1638_v6, %v649_v47 }
 0x557   : > { %v832_v46 = vpop.permute.xlu1 %831 }
 0x558   : > { %v834_v48 = vadd.f32 %v832_v46, %v829_v45 }
 0x559   : > { %1042 = sbr.rel (%p1228_p10) target bundleno = 1398 (0x576), region = 40 }
 0x55a   : > { %v1034_v53 = vsel %vm1033_vm8, %v1032_v51, %v834_v48 }
 0x55b   : > { %v1017_v50 = vpop.permute.xlu1 %1016 }
 0x55c   : > { %v1019_v52 = vadd.f32 %v1017_v50, %v1014_v49 }
 0x55e   : > { %v1036_v54 = vsel %vm1035_vm9, %v1034_v53, %v1019_v52 }
 0x55f   : > { %1038 = vst.msk [vmem:[#allocation4] sm:$0xff] %vm1037_vm10, %v1036_v54 }
 0x566   : > { %v1048_v2 = vld [vmem:[#allocation4] sm:$0xff] }
 0x567   : > { %v1054_v6 = vmul.f32 %v1052_v0, %v1048_v2  ;;  %v1059_v7 = vmul.f32 %v1057_v3, %v1048_v2 }
 0x569   : > { %v1070_v11 = vsel %vm287_vm2, %v1054_v6, %v1059_v7 }
 0x56c   : > { %v1062_v1 = vpop.permute.xlu1 %1061 }
 0x56d   : > { %v1064_v9 = vmul.f32 %v1062_v1, %v1048_v2 }
 0x56f   : > { %v1071_v12 = vsel %vm1033_vm8, %v1070_v11, %v1064_v9 }
 0x571   : > { %v1067_v5 = vpop.permute.xlu1 %1066 }
 0x572   : > { %v1069_v8 = vmul.f32 %v1067_v5, %v1048_v2 }
 0x574   : > { %v1072_v13 = vsel %vm1035_vm9, %v1071_v12, %v1069_v8 }
 0x575   : > { %1073 = vst.msk [vmem:[%s1538_s30] sm:$0xff] %vm1037_vm10, %v1072_v13 }
 0x576 PF: > { %s13_s18 = sadd.s32 1, %s1447_s18   ;;  %s1698_s12 = smov %s1435_s15 }
 0x577   : > { %p10_p11 = scmp.ge.s32.totalorder %s13_s18, 10   ;;  %s1699_s13 = smov %s1439_s16 }
 0x578   : > { %s1700_s14 = smov %s1443_s17  ;;  %s1701_s15 = smov %s1705_s19 }
 0x579   : > { %s1702_s16 = smov %s1709_s20  ;;  %s1703_s17 = smov %s1713_s21 }
 0x57a   :  { %12 = sbr.rel (!%p10_p11) target bundleno = 4 (0x4), region = 76 }

// kernel: flash_mha_forward.5
= control target key start
LH: loop header
LB: loop body
LE: loop exit
PB: predicated region body
PF: predicated region fallthrough
CT: control target
= control target key end

     0   :  { %vm30_vm0 = vcmask 261120   ;;  %s306_s0 = inlined_call_operand.vmem [shape: f32[32,32], index: 0, kind: input, shape index: {}]   ;;  %s307_s1 = inlined_call_operand.vmem [shape: f32[32,32], index: 1, kind: input, shape index: {}]   ;;  %s308_s2 = inlined_call_operand.vmem [shape: f32[1,32], index: 2, kind: input, shape index: {}]   ;;  %s309_s3 = inlined_call_operand.hbm [shape: f32[32,32], index: 3, kind: output, shape index: {}]  }
   0x1   :  { %v19_v0 = vld [vmem:[%s307_s1] sm:$0xff]  ;;  %v20_v1 = vld [vmem:[%s307_s1 + $0x8] sm:$0xff]  ;;  %v21_v2 = vld [vmem:[%s307_s1 + $0x10] sm:$0xff] }
   0x2   :  { %v191_v3 = vpack.c.bf16 %v20_v1, %v19_v0  ;;  %vm192_vm1 = vmpackc.low %vm30_vm0, %vm30_vm0  ;;  %v22_v4 = vld [vmem:[%s307_s1 + $0x18] sm:$0xff]  ;;  %v15_v5 = vld [vmem:[%s306_s0] sm:$0xff] }
   0x3   :  { %v197_v6 = vpack.c.bf16 %v22_v4, %v21_v2  ;;  %185 = vmatprep.mubr.msk.f32.mxu0 %vm30_vm0, %v15_v5  ;;  %v17_v7 = vld [vmem:[%s306_s0 + $0x10] sm:$0xff] }
   0x4   :  { %193 = vmatprep.subr.msk.bf16.mxu0 %vm192_vm1, %v191_v3  ;;  %203 = vmatprep.subr.msk.bf16.mxu1 %vm192_vm1, %v191_v3 }
   0x5   :  { %8 = vsyncpa [#allocation3], 0  ;;  %196 = vmatpush3.bf16.xpose.msk.msra.mxu0 %vm192_vm1, %v191_v3  ;;  %205 = vmatpush3.bf16.xpose.msk.msra.mxu1 %vm192_vm1, %v191_v3  ;;  %v16_v8 = vld [vmem:[%s306_s0 + $0x8] sm:$0xff]  ;;  %v18_v9 = vld [vmem:[%s306_s0 + $0x18] sm:$0xff]  ;;  %s234_s29 = smov [#allocation2]  }
   0x6   :  { %199 = vmatprep.subr.msk.bf16.mxu0 %vm192_vm1, %v197_v6  ;;  %204 = vmatprep.subr.msk.bf16.mxu1 %vm192_vm1, %v197_v6  ;;  %v160_v10 = vld [vmem:[%s308_s2] ss:$0 sm:$0xff]  ;;  %s149_s30 = sshll.u32 %s234_s29, 4  ;;  %s150_s30 = int_to_ptr.vmem [resolvable:$true] %s149_s30 }
   0x7   :  { %188 = vmatprep.mubr.msk.f32.mxu1 %vm30_vm0, %v17_v7  ;;  %s210_s0 = scalar_lea.vmem %s150_s30, 512  ;;  %p215_p1 = scmp.lt.s32.totalorder %s150_s30, %s150_s30 }
   0x8   :  { %p211_p0 = scmp.ne.s32.totalorder %s150_s30, %s210_s0  ;;  %p216_p2 = scmp.lt.s32.totalorder %s210_s0, %s210_s0 }
   0xa   :  { %p217_p3 = por %p216_p2, %p215_p1 }
   0xc   :  { %p218_p4 = pnand %p217_p3, %p211_p0 }
   0xd   :  { %202 = vmatpush3.bf16.xpose.msk.msra.mxu0 %vm192_vm1, %v197_v6  ;;  %206 = vmatpush3.bf16.xpose.msk.msra.mxu1 %vm192_vm1, %v197_v6 }
  0x14   :  { %186 = vmatmul.mubr.msk.f32.vlgmr.msra.gmra.mrb[0].mxu0 %vm30_vm0, %v16_v8  ;;  %189 = vmatmul.mubr.msk.f32.vlgmr.msra.gmra.mrb[0].mxu1 %vm30_vm0, %v18_v9 }
  0xe7   :  { %v187_v11 = vpop.f32.mrb[0].mxu0  ;;  %v190_v12 = vpop.f32.mrb[0].mxu1 }
  0xe8   :  { %v127_v13 = vadd.f32 %v187_v11, %v160_v10  ;;  %v137_v14 = vadd.f32 %v190_v12, %v160_v10  ;;  %v121_v15 = vpop.f32.mrb[1].mxu0  ;;  %v131_v16 = vpop.f32.mrb[1].mxu1 }
  0xe9   :  { %v122_v17 = vadd.f32 %v160_v10, %v121_v15  ;;  %v132_v18 = vadd.f32 %v160_v10, %v131_v16 }
  0xea   :  { %141 = vst.msk [vmem:[#allocation2 + $0x8] sm:$0xff] %vm30_vm0, %v127_v13  ;;  %143 = vst.msk [vmem:[#allocation2 + $0x18] sm:$0xff] %vm30_vm0, %v137_v14 }
  0xeb   :  { %140 = vst.msk [vmem:[#allocation2] sm:$0xff] %vm30_vm0, %v122_v17  ;;  %142 = vst.msk [vmem:[#allocation2 + $0x10] sm:$0xff] %vm30_vm0, %v132_v18 }
  0xec   :  { %221 = shalt.err (!%p218_p4)
}
  0xed   :  { %s222_s5 = scalar_lea.hbm %s309_s3, 512 }
  0xee   :  { %p223_p5 = scmp.ne.s32.totalorder %s309_s3, %s222_s5  ;;  %p226_p6 = scmp.lt.u32.totalorder %s222_s5, %s309_s3 }
  0xf0   :  { %p228_p7 = pnand %p226_p6, %p223_p5 }
  0xf2   :  { %231 = shalt.err (!%p228_p7)
}
  0xf3   :  { %s235_s10 = smov 128   ;;  %s236_s11 = smov 8  }
  0xf4   :  { %155 = dma.vmem_to_hbm [thread:$0]  %s150_s30, 512, %s309_s3, [#allocation3], %s235_s10, %s235_s10, %s236_s11  }
  0xf5   :  { %232 = dma.done.wait [#allocation3], 512  }
  0xf6   :  { %233 = vsyncadd [#allocation3], 4294966784 }
  0xf7   :  { %159 = vsyncpa [#allocation3], 1 }

</bundles_post_ra>
